<compile_context>
chip_gen: v7x
topology: tpu7x:2x2x1
jax: 0.10.0
libtpu: 0.0.40
codegen_flags: <defaults>
</compile_context>

<pallas_src>
import jax
import jax.numpy as jnp
from jax.experimental import pallas as pl
from jax.experimental.pallas import tpu as pltpu


def mlp_kernel(x_ref, w1_ref, b1_ref, w2_ref, b2_ref, o_ref):
    # x: (TM, C) bf16   w1: (C, H) bf16   b1: (1, H) f32
    # w2: (H, C) bf16   b2: (1, C) f32    o: (TM, C) f32
    x = x_ref[...]
    b1 = b1_ref[...]          # hoisted bias reads (no re-broadcast per op)
    b2 = b2_ref[...]

    # c_fc: bf16 MXU matmul, f32 accumulation
    h = jnp.dot(x, w1_ref[...], preferred_element_type=jnp.float32) + b1

    # exact (erf) GELU in f32 -- matches torch.nn.GELU() default
    h = 0.5 * h * (1.0 + jax.lax.erf(h * 0.7071067811865476))

    # c_proj: cast intermediate back to bf16 for the MXU, accumulate in f32
    out = jnp.dot(h.astype(jnp.bfloat16), w2_ref[...],
                  preferred_element_type=jnp.float32) + b2
    o_ref[...] = out.astype(o_ref.dtype)


def _round_up(x, m):
    return pl.cdiv(x, m) * m


def _vmem_budget_bytes(tm, c_pad, h_pad):
    # resident bf16 weights (double-buffer allocation assumed for safety)
    w = 2 * (c_pad * h_pad * 2 + h_pad * c_pad * 2)
    b = 2 * (h_pad * 4 + c_pad * 4)
    # double-buffered activation in (bf16) / out (f32) tiles
    xio = 2 * (tm * c_pad * 2) + 2 * (tm * c_pad * 4)
    # f32 GELU intermediate
    inter = tm * h_pad * 4
    return w + b + xio + inter


def _choose_tm(m_pad, c_pad, h_pad, cap_bytes=48 * 1024 * 1024):
    # Largest row tile (<=1024) whose working set fits the VMEM cap.
    # Cap is conservative for v7x (64 MiB/TC); v5e/v6e (128 MiB) fit easily.
    tm = min(1024, m_pad)
    tm = _round_up(tm, 8)
    while tm > 8 and _vmem_budget_bytes(tm, c_pad, h_pad) > cap_bytes:
        tm = max(8, _round_up(tm // 2, 8))
    return tm


def mlp_forward(x, w_fc, b_fc, w_proj, b_proj):
    """x: (B, T, C). w_fc: (4C, C), b_fc: (4C,), w_proj: (C, 4C), b_proj: (C,)."""
    B, T, C = x.shape
    H = w_fc.shape[0]
    M = B * T

    # lane-dense padding (multiples of 128 on the feature dims)
    c_pad = _round_up(C, 128)
    h_pad = _round_up(H, 128)
    tm = _choose_tm(_round_up(M, 8), c_pad, h_pad)
    m_pad = _round_up(M, tm)

    # pad + cast matmul operands to bf16 (biases stay f32)
    x2d = jnp.pad(x.reshape(M, C), ((0, m_pad - M), (0, c_pad - C))).astype(jnp.bfloat16)
    w1 = jnp.pad(w_fc.T, ((0, c_pad - C), (0, h_pad - H))).astype(jnp.bfloat16)   # (C, H)
    b1 = jnp.pad(b_fc.reshape(1, H), ((0, 0), (0, h_pad - H))).astype(jnp.float32)
    w2 = jnp.pad(w_proj.T, ((0, h_pad - H), (0, c_pad - C))).astype(jnp.bfloat16)  # (H, C)
    b2 = jnp.pad(b_proj.reshape(1, C), ((0, 0), (0, c_pad - C))).astype(jnp.float32)

    grid = (m_pad // tm,)
    vmem_limit = int(min(max(2 * _vmem_budget_bytes(tm, c_pad, h_pad), 16 * 1024 * 1024),
                         48 * 1024 * 1024))

    cost = pl.CostEstimate(
        flops=4 * m_pad * c_pad * h_pad,              # two matmuls, 2*M*C*H each
        transcendentals=m_pad * h_pad,                # erf on the intermediate
        bytes_accessed=(m_pad * c_pad * 2             # x (bf16)
                        + c_pad * h_pad * 2           # w1 (bf16)
                        + h_pad * 4                   # b1
                        + h_pad * c_pad * 2           # w2 (bf16)
                        + c_pad * 4                   # b2
                        + m_pad * c_pad * 4),         # out (f32)
    )

    out = pl.pallas_call(
        mlp_kernel,
        out_shape=jax.ShapeDtypeStruct((m_pad, c_pad), jnp.float32),
        grid_spec=pltpu.PrefetchScalarGridSpec(
            num_scalar_prefetch=0,
            grid=grid,
            in_specs=[
                pl.BlockSpec((tm, c_pad), lambda i: (i, 0)),       # x tiles stream
                pl.BlockSpec((c_pad, h_pad), lambda i: (0, 0)),    # w1 resident
                pl.BlockSpec((1, h_pad), lambda i: (0, 0)),        # b1 resident
                pl.BlockSpec((h_pad, c_pad), lambda i: (0, 0)),    # w2 resident
                pl.BlockSpec((1, c_pad), lambda i: (0, 0)),        # b2 resident
            ],
            out_specs=pl.BlockSpec((tm, c_pad), lambda i: (i, 0)),
        ),
        compiler_params=pltpu.CompilerParams(
            dimension_semantics=("parallel",),                     # megacore / 2-TC shard
            vmem_limit_bytes=vmem_limit,
        ),
        cost_estimate=cost,
    )(x2d, w1, b1, w2, b2)

    return out[:M, :C].reshape(B, T, C).astype(x.dtype)


if __name__ == "__main__":
    # config.n_embd = 32; batch=2, seq=8  (toy GPT MLP shapes)
    B, T, C = 2, 8, 32
    H = 4 * C

    key = jax.random.PRNGKey(0)
    kx, kw1, kb1, kw2, kb2 = jax.random.split(key, 5)

    x = jax.random.normal(kx, (B, T, C), dtype=jnp.float32)
    # deterministic init roughly matching nn.Linear's uniform(-1/sqrt(in), 1/sqrt(in))
    w_fc = jax.random.uniform(kw1, (H, C), jnp.float32, -1.0 / (C ** 0.5), 1.0 / (C ** 0.5))
    b_fc = jax.random.uniform(kb1, (H,), jnp.float32, -1.0 / (C ** 0.5), 1.0 / (C ** 0.5))
    w_proj = jax.random.uniform(kw2, (C, H), jnp.float32, -1.0 / (H ** 0.5), 1.0 / (H ** 0.5))
    b_proj = jax.random.uniform(kb2, (C,), jnp.float32, -1.0 / (H ** 0.5), 1.0 / (H ** 0.5))

    out = mlp_forward(x, w_fc, b_fc, w_proj, b_proj)
    jax.block_until_ready(out)

    # reference check in plain JAX (f32); bf16 MXU operands loosen the tolerance
    h_ref = x.reshape(B * T, C) @ w_fc.T + b_fc
    h_ref = 0.5 * h_ref * (1.0 + jax.lax.erf(h_ref / jnp.sqrt(2.0)))
    ref = (h_ref @ w_proj.T + b_proj).reshape(B, T, C)
    assert jnp.allclose(out, ref, atol=2e-2, rtol=2e-2), "mismatch vs reference"

    print("KERNEL_OK")
</pallas_src>

<mosaic_0001>
module attributes {stable_mosaic.version = 11 : i64} {
  func.func @mlp_kernel(%arg0: i32, %arg1: memref<16x128xbf16, #tpu.memory_space<vmem>>, %arg2: memref<128x128xbf16, #tpu.memory_space<vmem>>, %arg3: memref<1x128xf32, #tpu.memory_space<vmem>>, %arg4: memref<128x128xbf16, #tpu.memory_space<vmem>>, %arg5: memref<1x128xf32, #tpu.memory_space<vmem>>, %arg6: memref<16x128xf32, #tpu.memory_space<vmem>>) attributes {dimension_semantics = [#tpu.dimension_semantics<parallel>], iteration_bounds = array<i64: 1>, scalar_prefetch = 0 : i64, scratch_operands = 0 : i64, tpu.core_type = #tpu.core_type<tc>, window_params = [{transform_indices = @transform_0, window_bounds = array<i64: 16, 128>}, {pipeline_mode = #tpu.pipeline_mode<synchronous>, transform_indices = @transform_1, window_bounds = array<i64: 128, 128>}, {pipeline_mode = #tpu.pipeline_mode<synchronous>, transform_indices = @transform_2, window_bounds = array<i64: 1, 128>}, {pipeline_mode = #tpu.pipeline_mode<synchronous>, transform_indices = @transform_3, window_bounds = array<i64: 128, 128>}, {pipeline_mode = #tpu.pipeline_mode<synchronous>, transform_indices = @transform_4, window_bounds = array<i64: 1, 128>}, {transform_indices = @transform_5, window_bounds = array<i64: 16, 128>}]} {
    %c0 = arith.constant 0 : index
    %c0_0 = arith.constant 0 : index
    %0 = vector.load %arg1[%c0, %c0_0] : memref<16x128xbf16, #tpu.memory_space<vmem>>, vector<16x128xbf16>
    %c0_1 = arith.constant 0 : index
    %c0_2 = arith.constant 0 : index
    %1 = vector.load %arg3[%c0_1, %c0_2] : memref<1x128xf32, #tpu.memory_space<vmem>>, vector<1x128xf32>
    %c0_3 = arith.constant 0 : index
    %c0_4 = arith.constant 0 : index
    %2 = vector.load %arg5[%c0_3, %c0_4] : memref<1x128xf32, #tpu.memory_space<vmem>>, vector<1x128xf32>
    %c0_5 = arith.constant 0 : index
    %c0_6 = arith.constant 0 : index
    %3 = vector.load %arg2[%c0_5, %c0_6] : memref<128x128xbf16, #tpu.memory_space<vmem>>, vector<128x128xbf16>
    %cst = arith.constant dense<0.000000e+00> : vector<16x128xf32>
    %4 = tpu.matmul %0, %3, %cst {dimension_numbers = #tpu.dot_dimension_numbers<[1], [0], [0], [1], [0, 0, 1, 1], [], []>} : vector<16x128xbf16>, vector<128x128xbf16>, vector<16x128xf32> -> vector<16x128xf32>
    %5 = vector.broadcast %1 : vector<1x128xf32> to vector<16x128xf32>
    %6 = arith.addf %4, %5 : vector<16x128xf32>
    %cst_7 = arith.constant 5.000000e-01 : f32
    %7 = vector.broadcast %cst_7 : f32 to vector<16x128xf32>
    %8 = arith.mulf %7, %6 : vector<16x128xf32>
    %cst_8 = arith.constant 0.707106769 : f32
    %9 = vector.broadcast %cst_8 : f32 to vector<16x128xf32>
    %10 = arith.mulf %6, %9 : vector<16x128xf32>
    %11 = math.erf %10 : vector<16x128xf32>
    %cst_9 = arith.constant 1.000000e+00 : f32
    %12 = vector.broadcast %cst_9 : f32 to vector<16x128xf32>
    %13 = arith.addf %12, %11 : vector<16x128xf32>
    %14 = arith.mulf %8, %13 : vector<16x128xf32>
    %15 = arith.truncf %14 : vector<16x128xf32> to vector<16x128xbf16>
    %c0_10 = arith.constant 0 : index
    %c0_11 = arith.constant 0 : index
    %16 = vector.load %arg4[%c0_10, %c0_11] : memref<128x128xbf16, #tpu.memory_space<vmem>>, vector<128x128xbf16>
    %cst_12 = arith.constant dense<0.000000e+00> : vector<16x128xf32>
    %17 = tpu.matmul %15, %16, %cst_12 {dimension_numbers = #tpu.dot_dimension_numbers<[1], [0], [0], [1], [0, 0, 1, 1], [], []>} : vector<16x128xbf16>, vector<128x128xbf16>, vector<16x128xf32> -> vector<16x128xf32>
    %18 = vector.broadcast %2 : vector<1x128xf32> to vector<16x128xf32>
    %19 = arith.addf %17, %18 : vector<16x128xf32>
    %c0_13 = arith.constant 0 : index
    %c0_14 = arith.constant 0 : index
    %20 = vector.load %arg6[%c0_13, %c0_14] : memref<16x128xf32, #tpu.memory_space<vmem>>, vector<16x128xf32>
    tpu.vector_store %arg6[%c0_13, %c0_14], %19 {strides = array<i32>} : memref<16x128xf32, #tpu.memory_space<vmem>>, vector<16x128xf32>,
    return
  }
  func.func @transform_0(%arg0: i32) -> (i32, i32) {
    %c0_i32 = arith.constant 0 : i32
    %c0_i32_0 = arith.constant 0 : i32
    return %arg0, %c0_i32 : i32, i32
  }
  func.func @transform_1(%arg0: i32) -> (i32, i32) {
    %c0_i32 = arith.constant 0 : i32
    %c0_i32_0 = arith.constant 0 : i32
    %c0_i32_1 = arith.constant 0 : i32
    return %c0_i32, %c0_i32_0 : i32, i32
  }
  func.func @transform_2(%arg0: i32) -> (i32, i32) {
    %c0_i32 = arith.constant 0 : i32
    %c0_i32_0 = arith.constant 0 : i32
    %c0_i32_1 = arith.constant 0 : i32
    return %c0_i32, %c0_i32_0 : i32, i32
  }
  func.func @transform_3(%arg0: i32) -> (i32, i32) {
    %c0_i32 = arith.constant 0 : i32
    %c0_i32_0 = arith.constant 0 : i32
    %c0_i32_1 = arith.constant 0 : i32
    return %c0_i32, %c0_i32_0 : i32, i32
  }
  func.func @transform_4(%arg0: i32) -> (i32, i32) {
    %c0_i32 = arith.constant 0 : i32
    %c0_i32_0 = arith.constant 0 : i32
    %c0_i32_1 = arith.constant 0 : i32
    return %c0_i32, %c0_i32_0 : i32, i32
  }
  func.func @transform_5(%arg0: i32) -> (i32, i32) {
    %c0_i32 = arith.constant 0 : i32
    %c0_i32_0 = arith.constant 0 : i32
    return %arg0, %c0_i32 : i32, i32
  }
}

</mosaic_0001>

<bundles_post_ra>
// kernel: tpu_custom_call.1
= control target key start
LH: loop header
LB: loop body
LE: loop exit
PB: predicated region body
PF: predicated region fallthrough
CT: control target
= control target key end

     0   :  { %10 = vsyncpa [#allocation3], 0  ;;  %s638_s0 = inlined_call_operand.hbm [shape: bf16[16,128], index: 0, kind: input, shape index: {}]   ;;  %s639_s1 = inlined_call_operand.hbm [shape: bf16[128,128], index: 1, kind: input, shape index: {}]   ;;  %s640_s2 = inlined_call_operand.vmem [shape: f32[1,128], index: 2, kind: input, shape index: {}]   ;;  %s641_s3 = inlined_call_operand.hbm [shape: bf16[128,128], index: 3, kind: input, shape index: {}]   ;;  %s642_s4 = inlined_call_operand.vmem [shape: f32[1,128], index: 4, kind: input, shape index: {}]   ;;  %s643_s5 = inlined_call_operand.hbm [shape: f32[16,128], index: 5, kind: output, shape index: {}]  }
   0x1   :  { %11 = vsyncpa [#allocation6], 0 }
   0x2   :  { %12 = vsyncpa [#allocation4], 0  ;;  %s528_s18 = smov [#allocation5]   ;;  %s529_s20 = smov [#allocation2]  }
   0x3   :  { %s30_s19 = sshll.u32 %s528_s18, 4  ;;  %s18_s21 = sshll.u32 %s529_s20, 4  ;;  %s31_s19 = int_to_ptr.vmem [resolvable:$true] %s30_s19  ;;  %s568_s21 = int_to_ptr.vmem [resolvable:$true] %s18_s21 }
   0x4   :  { %s434_s24 = scalar_lea.hbm %s639_s1, 1024 }
   0x5   :  { %p435_p0 = scmp.ne.s32.totalorder %s639_s1, %s434_s24  ;;  %p438_p1 = scmp.lt.u32.totalorder %s434_s24, %s639_s1 }
   0x7   :  { %p440_p2 = pnand %p438_p1, %p435_p0 }
   0x9   :  { %443 = shalt.err (!%p440_p2)
}
   0xa   :  { %s444_s29 = scalar_lea.vmem %s31_s19, 1024  ;;  %p449_p4 = scmp.lt.s32.totalorder %s31_s19, %s31_s19 }
   0xb   :  { %p445_p3 = scmp.ne.s32.totalorder %s31_s19, %s444_s29  ;;  %p450_p5 = scmp.lt.s32.totalorder %s444_s29, %s444_s29 }
   0xd   :  { %p451_p6 = por %p450_p5, %p449_p4 }
   0xf   :  { %p452_p7 = pnand %p451_p6, %p445_p3 }
  0x11   :  { %455 = shalt.err (!%p452_p7)
}
  0x12   :  { %s530_s30 = smov 64   ;;  %s531_s6 = smov 4  }
  0x13   :  { %36 = dma.hbm_to_vmem [thread:$0]  %s639_s1, 1024, %s31_s19, [#allocation6], %s530_s30, %s530_s30, %s531_s6  }
  0x14   :  { %s456_s11 = scalar_lea.hbm %s638_s0, 128 }
  0x15   :  { %p457_p8 = scmp.ne.s32.totalorder %s638_s0, %s456_s11  ;;  %p460_p9 = scmp.lt.u32.totalorder %s456_s11, %s638_s0 }
  0x17   :  { %p462_p10 = pnand %p460_p9, %p457_p8 }
  0x19   :  { %465 = shalt.err (!%p462_p10)
}
  0x1a   :  { %s466_s16 = scalar_lea.vmem %s568_s21, 128  ;;  %p471_p12 = scmp.lt.s32.totalorder %s568_s21, %s568_s21 }
  0x1b   :  { %p467_p11 = scmp.ne.s32.totalorder %s568_s21, %s466_s16  ;;  %p472_p13 = scmp.lt.s32.totalorder %s466_s16, %s466_s16 }
  0x1d   :  { %p473_p0 = por %p472_p13, %p471_p12 }
  0x1f   :  { %p474_p1 = pnand %p473_p0, %p467_p11 }
  0x21   :  { %477 = shalt.err (!%p474_p1)
}
  0x22   :  { %24 = dma.hbm_to_vmem [thread:$0]  %s638_s0, 128, %s568_s21, [#allocation3], %s530_s30, %s530_s30, %s531_s6  }
  0x23   :  { %s532_s18 = smov [#allocation7]   ;;  %s478_s23 = scalar_lea.hbm %s641_s3, 1024 }
  0x24   :  { %s44_s19 = sshll.u32 %s532_s18, 4  ;;  %p479_p2 = scmp.ne.s32.totalorder %s641_s3, %s478_s23  ;;  %s45_s19 = int_to_ptr.vmem [resolvable:$true] %s44_s19 }
  0x25   :  { %p482_p3 = scmp.lt.u32.totalorder %s478_s23, %s641_s3 }
  0x27   :  { %p484_p4 = pnand %p482_p3, %p479_p2 }
  0x29   :  { %487 = shalt.err (!%p484_p4)
}
  0x2a   :  { %s488_s28 = scalar_lea.vmem %s45_s19, 1024  ;;  %p493_p6 = scmp.lt.s32.totalorder %s45_s19, %s45_s19 }
  0x2b   :  { %p489_p5 = scmp.ne.s32.totalorder %s45_s19, %s488_s28  ;;  %p494_p7 = scmp.lt.s32.totalorder %s488_s28, %s488_s28 }
  0x2d   :  { %p495_p8 = por %p494_p7, %p493_p6 }
  0x2f   :  { %p496_p9 = pnand %p495_p8, %p489_p5 }
  0x31   :  { %499 = shalt.err (!%p496_p9)
}
  0x32   :  { %50 = dma.hbm_to_vmem [thread:$0]  %s641_s3, 1024, %s45_s19, [#allocation6], %s530_s30, %s530_s30, %s531_s6  }
  0x33   :  { %522 = dma.done.wait [#allocation3], 128  }
  0x34   :  { %523 = vsyncadd [#allocation3], 4294967168 }
  0x35   :  { %524 = dma.done.wait [#allocation6], 2048  }
  0x36   :  { %525 = vsyncadd [#allocation6], 4294965248  ;;  %v533_v0 = vmov 0.0   ;;  %vm534_vm0 = vmmov 0   ;;  %v413_v1 = vld [vmem:[#allocation5] sm:$0xff]   ;;  %v414_v2 = vld [vmem:[#allocation5 + $0x8] sm:$0xff]  }
  0x37   :  { %363 = vmatprep.subr.bf16.mxu0 %v533_v0  ;;  %379 = vmatprep.mubr.msk.bf16.mxu0 %vm534_vm0, %v533_v0  ;;  %v415_v3 = vld [vmem:[#allocation5 + $0x10] sm:$0xff]   ;;  %v422_v4 = vld [vmem:[#allocation7] sm:$0xff]   ;;  %v416_v5 = vld [vmem:[#allocation5 + $0x18] sm:$0xff]   ;;  %s535_s6 = smov [#allocation8]  }
  0x38   :  { %383 = vmatprep.subr.bf16.mxu1 %v533_v0  ;;  %399 = vmatprep.mubr.msk.bf16.mxu1 %vm534_vm0, %v533_v0  ;;  %v423_v6 = vld [vmem:[#allocation7 + $0x8] sm:$0xff]   ;;  %v417_v7 = vld [vmem:[#allocation5 + $0x20] sm:$0xff]   ;;  %v419_v9 = vld [vmem:[#allocation5 + $0x30] sm:$0xff]   ;;  %s313_s7 = sshll.u32 %s535_s6, 4  ;;  %s314_s7 = int_to_ptr.vmem [resolvable:$true] %s313_s7 }
  0x39   :  { %364 = vmatpush3.bf16.msra.mxu0 %v413_v1  ;;  %384 = vmatpush3.bf16.msra.mxu1 %v422_v4  ;;  %v418_v8 = vld [vmem:[#allocation5 + $0x28] sm:$0xff]   ;;  %v420_v10 = vld [vmem:[#allocation5 + $0x38] sm:$0xff]   ;;  %v424_v12 = vld [vmem:[#allocation7 + $0x10] sm:$0xff]   ;;  %s500_s8 = scalar_lea.vmem %s314_s7, 256  ;;  %p505_p11 = scmp.lt.s32.totalorder %s314_s7, %s314_s7 }
  0x3a   :  { %365 = vmatprep.subr.bf16.mxu0 %v533_v0  ;;  %385 = vmatprep.subr.bf16.mxu1 %v533_v0  ;;  %v421_v11 = vld [vmem:[#allocation2] sm:$0xff]   ;;  %v426_v14 = vld [vmem:[#allocation7 + $0x20] sm:$0xff]   ;;  %v427_v15 = vld [vmem:[#allocation7 + $0x28] sm:$0xff]   ;;  %p501_p10 = scmp.ne.s32.totalorder %s314_s7, %s500_s8  ;;  %p506_p12 = scmp.lt.s32.totalorder %s500_s8, %s500_s8 }
  0x3b   :  { %v425_v13 = vld [vmem:[#allocation7 + $0x18] sm:$0xff]   ;;  %v428_v16 = vld [vmem:[#allocation7 + $0x30] sm:$0xff]  }
  0x3c   :  { %v429_v17 = vld [vmem:[#allocation7 + $0x38] sm:$0xff]   ;;  %p507_p13 = por %p506_p12, %p505_p11 }
  0x3d   :  { %366 = vmatpush3.bf16.msra.mxu0 %v414_v2  ;;  %386 = vmatpush3.bf16.msra.mxu1 %v423_v6  ;;  %v326_v18 = vld [vmem:[%s640_s2] ss:$0 sm:$0xff] }
  0x3e   :  { %367 = vmatprep.subr.bf16.mxu0 %v533_v0  ;;  %387 = vmatprep.subr.bf16.mxu1 %v533_v0  ;;  %v336_v36 = vld [vmem:[%s642_s4] ss:$0 sm:$0xff]  ;;  %p508_p0 = pnand %p507_p13, %p501_p10 }
  0x41   :  { %368 = vmatpush3.bf16.msra.mxu0 %v415_v3  ;;  %388 = vmatpush3.bf16.msra.mxu1 %v424_v12 }
  0x42   :  { %369 = vmatprep.subr.bf16.mxu0 %v533_v0  ;;  %389 = vmatprep.subr.bf16.mxu1 %v533_v0 }
  0x45   :  { %370 = vmatpush3.bf16.msra.mxu0 %v416_v5  ;;  %390 = vmatpush3.bf16.msra.mxu1 %v425_v13 }
  0x46   :  { %371 = vmatprep.subr.bf16.mxu0 %v533_v0  ;;  %391 = vmatprep.subr.bf16.mxu1 %v533_v0 }
  0x49   :  { %372 = vmatpush3.bf16.msra.mxu0 %v417_v7  ;;  %392 = vmatpush3.bf16.msra.mxu1 %v426_v14 }
  0x4a   :  { %373 = vmatprep.subr.bf16.mxu0 %v533_v0  ;;  %393 = vmatprep.subr.bf16.mxu1 %v533_v0 }
  0x4d   :  { %374 = vmatpush3.bf16.msra.mxu0 %v418_v8  ;;  %394 = vmatpush3.bf16.msra.mxu1 %v427_v15 }
  0x4e   :  { %375 = vmatprep.subr.bf16.mxu0 %v533_v0  ;;  %395 = vmatprep.subr.bf16.mxu1 %v533_v0 }
  0x51   :  { %376 = vmatpush3.bf16.msra.mxu0 %v419_v9  ;;  %396 = vmatpush3.bf16.msra.mxu1 %v428_v16 }
  0x52   :  { %377 = vmatprep.subr.bf16.mxu0 %v533_v0  ;;  %397 = vmatprep.subr.bf16.mxu1 %v533_v0 }
  0x55   :  { %378 = vmatpush3.bf16.msra.mxu0 %v420_v10  ;;  %398 = vmatpush3.bf16.msra.mxu1 %v429_v17 }
  0x58   :  { %380 = vmatmul.mubr.bf16.vlgmr.msra.gmra.mrb[0].mxu0 %v421_v11 }
 0x12b   :  { %v177_v19 = vpop.f32.mrb[0].mxu0 }
 0x12c   :  { %v178_v20 = vadd.f32 %v326_v18, %v177_v19  ;;  %v381_v21 = vpop.f32.mrb[1].mxu0 }
 0x12d   :  { %v180_v22 = vpop.f32.mrb[2].mxu0 }
 0x12e   :  { %v186_v23 = vmul.f32 0.70710677, %v178_v20  ;;  %v181_v24 = vadd.f32 %v326_v18, %v180_v22  ;;  %v382_v25 = vpop.f32.mrb[3].mxu0  ;;  %v184_v30 = vmul.f32 0.5, %v178_v20 }
 0x130   :  { %430 = verf.f32 %v186_v23  ;;  %v187_v26 = vmul.f32 0.70710677, %v181_v24  ;;  %v185_v31 = vmul.f32 0.5, %v181_v24 }
 0x132   :  { %432 = verf.f32 %v187_v26 }
 0x13a   :  { %v431_v27 = vpop.eup %430 }
 0x13b   :  { %v190_v28 = vadd.f32 1.0, %v431_v27 }
 0x13c   :  { %v433_v29 = vpop.eup %432 }
 0x13d   :  { %v191_v32 = vadd.f32 1.0, %v433_v29  ;;  %v192_v33 = vmul.f32 %v190_v28, %v184_v30 }
 0x13f   :  { %v193_v34 = vmul.f32 %v191_v32, %v185_v31 }
 0x141   :  { %v194_v35 = vpack.c.bf16 %v193_v34, %v192_v33 }
 0x143   :  { %400 = vmatmul.mubr.bf16.vlgmr.msra.gmra.mrb[0].mxu1 %v194_v35 }
 0x216   :  { %v299_v37 = vpop.f32.mrb[0].mxu1 }
 0x217   :  { %v300_v38 = vadd.f32 %v336_v36, %v299_v37  ;;  %v401_v39 = vpop.f32.mrb[1].mxu1 }
 0x218   :  { %v302_v40 = vpop.f32.mrb[2].mxu1 }
 0x219   :  { %306 = vst [vmem:[#allocation8] sm:$0xff] %v300_v38  ;;  %v303_v41 = vadd.f32 %v336_v36, %v302_v40  ;;  %v402_v42 = vpop.f32.mrb[3].mxu1 }
 0x21b   :  { %307 = vst [vmem:[#allocation8 + $0x8] sm:$0xff] %v303_v41 }
 0x21c   :  { %511 = shalt.err (!%p508_p0)
}
 0x21d   :  { %s512_s10 = scalar_lea.hbm %s643_s5, 256 }
 0x21e   :  { %p513_p1 = scmp.ne.s32.totalorder %s643_s5, %s512_s10  ;;  %p516_p2 = scmp.lt.u32.totalorder %s512_s10, %s643_s5 }
 0x220   :  { %p518_p3 = pnand %p516_p2, %p513_p1 }
 0x222   :  { %521 = shalt.err (!%p518_p3)
}
 0x223   :  { %s536_s15 = smov 128   ;;  %s537_s16 = smov 8  }
 0x224   :  { %319 = dma.vmem_to_hbm [thread:$0]  %s314_s7, 256, %s643_s5, [#allocation4], %s536_s15, %s536_s15, %s537_s16  }
 0x225   :  { %526 = dma.done.wait [#allocation4], 256  }
 0x226   :  { %527 = vsyncadd [#allocation4], 4294967040 }
 0x227   :  { %323 = vsyncpa [#allocation3], 1 }
 0x228   :  { %324 = vsyncpa [#allocation6], 1 }
 0x229   :  { %325 = vsyncpa [#allocation4], 1 }

</bundles_post_ra>
